<compile_context>
chip_gen: v7x
topology: tpu7x:2x2x1
jax: 0.10.0
libtpu: 0.0.40
codegen_flags: <defaults>
</compile_context>

<pallas_src>
import functools

import jax
import jax.numpy as jnp
from jax import lax
from jax.experimental import pallas as pl
from jax.experimental.pallas import tpu as pltpu


def _round_up(x, m):
    return ((x + m - 1) // m) * m


def _pad2(arr, rows, cols, dtype):
    r, c = arr.shape
    return jnp.pad(arr.astype(dtype), ((0, rows - r), (0, cols - c)))


def _vmem_limit_bytes():
    # generation-aware budget: ~7/8 of physical VMEM
    #   v5e/v6e: 128 MiB -> 112 MiB,   v7x: 64 MiB -> 56 MiB
    cap = 64 * 1024 * 1024
    try:
        info = pltpu.get_tpu_info()
        cap = int(getattr(info, "vmem_capacity_bytes", cap))
    except Exception:
        pass
    return (cap // 8) * 7


def _pick_tile(n_pad, target, *, min_tiles=1):
    """Largest 128-multiple that divides n_pad, is <= target, and (if possible)
    leaves at least `min_tiles` tiles along the axis (v7x megacore)."""
    cap = min(target, n_pad // min_tiles) if min_tiles > 1 else min(target, n_pad)
    best = 128
    t = 128
    while t <= n_pad:
        if n_pad % t == 0 and t <= cap:
            best = t
        t += 128
    return best


def _transform_row_target(f, h, limit):
    """Row-tile target for the feature transform so double-buffered X/W blocks
    stay comfortably inside the VMEM limit even for very wide features."""
    target = 1024
    while target > 128 and 4 * target * f + 4 * f * h > limit // 2:
        target //= 2
    return target


# --------------------------------------------------------------------------
# Feature transform:  Y = X @ W   (row-tiled; W resident in VMEM)
# --------------------------------------------------------------------------
def _transform_kernel(x_ref, w_ref, o_ref):
    o_ref[...] = jnp.dot(
        x_ref[...], w_ref[...], preferred_element_type=jnp.float32
    ).astype(o_ref.dtype)


def feature_transform(x, w, *, tm, vmem_limit):
    n, f = x.shape
    h = w.shape[1]
    return pl.pallas_call(
        _transform_kernel,
        out_shape=jax.ShapeDtypeStruct((n, h), jnp.bfloat16),
        grid_spec=pltpu.PrefetchScalarGridSpec(
            num_scalar_prefetch=0,
            grid=(n // tm,),
            in_specs=[
                pl.BlockSpec((tm, f), lambda i: (i, 0)),
                pl.BlockSpec((f, h), lambda i: (0, 0)),   # W resident
            ],
            out_specs=pl.BlockSpec((tm, h), lambda i: (i, 0)),
        ),
        compiler_params=pltpu.CompilerParams(
            dimension_semantics=("parallel",),
            vmem_limit_bytes=vmem_limit,
        ),
    )(x, w)


# --------------------------------------------------------------------------
# Graph aggregation:  Y = act(A_hat @ XW + b)
#   grid = (row tiles [parallel], contraction tiles [arbitrary])
#   relu layer:        f32 VMEM scratch accumulator, bf16 output
#   log_softmax layer: accumulates in place into the f32 output block
# --------------------------------------------------------------------------
def _aggregate_kernel(a_ref, xw_ref, b_ref, o_ref, *scratch, tk, xw_resident,
                      n_valid_cols, activation):
    acc_ref = scratch[0] if scratch else o_ref
    k = pl.program_id(1)

    @pl.when(k == 0)
    def _init():
        acc_ref[...] = jnp.zeros_like(acc_ref)

    if xw_resident:
        # XW panel is resident in VMEM as the full (n_pad, h) array; slice the
        # k-th row stripe in-kernel instead of re-streaming it from HBM.
        start = pl.multiple_of(k * tk, tk)
        xw = xw_ref[pl.ds(start, tk), :]
    else:
        xw = xw_ref[...]

    acc_ref[...] += jnp.dot(a_ref[...], xw, preferred_element_type=jnp.float32)

    @pl.when(k == pl.num_programs(1) - 1)
    def _finalize():
        h = acc_ref[...] + b_ref[...]          # bias added exactly once (f32)
        if activation == "relu":
            o_ref[...] = jnp.maximum(h, 0.0).astype(o_ref.dtype)
        else:  # masked log_softmax over the (padded) feature axis
            col = lax.broadcasted_iota(jnp.int32, h.shape, 1)
            valid = col < n_valid_cols
            m = jnp.max(jnp.where(valid, h, -jnp.inf), axis=1, keepdims=True)
            z = h - m
            p = jnp.where(valid, jnp.exp(z), 0.0)
            lse = jnp.log(jnp.sum(p, axis=1, keepdims=True))
            o_ref[...] = (z - lse).astype(o_ref.dtype)


def graph_aggregate(a, xw, b, *, tm, tk, n_valid_cols, activation, out_dtype,
                    vmem_limit):
    n = a.shape[0]
    h = xw.shape[1]

    # Keep the whole XW panel resident in VMEM when cheap; otherwise stream
    # (tk, h) stripes per contraction step (only for very large graphs).
    xw_resident = 4 * n * h <= vmem_limit // 4
    if xw_resident:
        xw_spec = pl.BlockSpec((n, h), lambda i, k: (0, 0))
    else:
        xw_spec = pl.BlockSpec((tk, h), lambda i, k: (k, 0))

    # relu layer needs a separate f32 accumulator (bf16 output); the f32
    # log_softmax layer accumulates directly into its output block.
    use_scratch = activation == "relu"
    scratch_shapes = [pltpu.VMEM((tm, h), jnp.float32)] if use_scratch else []

    kernel = functools.partial(
        _aggregate_kernel, tk=tk, xw_resident=xw_resident,
        n_valid_cols=n_valid_cols, activation=activation)

    return pl.pallas_call(
        kernel,
        out_shape=jax.ShapeDtypeStruct((n, h), out_dtype),
        grid_spec=pltpu.PrefetchScalarGridSpec(
            num_scalar_prefetch=0,
            grid=(n // tm, n // tk),
            in_specs=[
                # A_hat tile dominates HBM traffic; if xprof shows exposed DMA
                # at tile boundaries, try pipeline_mode=pl.Buffered(3) here.
                pl.BlockSpec((tm, tk), lambda i, k: (i, k)),
                xw_spec,
                pl.BlockSpec((1, h), lambda i, k: (0, 0)),    # bias (f32)
            ],
            out_specs=pl.BlockSpec((tm, h), lambda i, k: (i, 0)),
            scratch_shapes=scratch_shapes,
        ),
        compiler_params=pltpu.CompilerParams(
            dimension_semantics=("parallel", "arbitrary"),
            vmem_limit_bytes=vmem_limit,
        ),
    )(a, xw, b)


# --------------------------------------------------------------------------
# Fused single-call path for graphs that fit in VMEM: A_hat read from HBM once.
# --------------------------------------------------------------------------
def _fused_kernel(a_ref, x_ref, w1_ref, b1_ref, w2_ref, b2_ref, o_ref, *,
                  n_valid_cols):
    a = a_ref[...]
    xw1 = jnp.dot(x_ref[...], w1_ref[...], preferred_element_type=jnp.float32)
    h1 = jnp.maximum(
        jnp.dot(a, xw1.astype(jnp.bfloat16), preferred_element_type=jnp.float32)
        + b1_ref[...], 0.0)
    # TODO(synk): training-mode dropout would go here; identity in eval mode.
    hw2 = jnp.dot(h1.astype(jnp.bfloat16), w2_ref[...],
                  preferred_element_type=jnp.float32)
    h2 = jnp.dot(a, hw2.astype(jnp.bfloat16),
                 preferred_element_type=jnp.float32) + b2_ref[...]
    col = lax.broadcasted_iota(jnp.int32, h2.shape, 1)
    valid = col < n_valid_cols
    m = jnp.max(jnp.where(valid, h2, -jnp.inf), axis=1, keepdims=True)
    z = h2 - m
    p = jnp.where(valid, jnp.exp(z), 0.0)
    lse = jnp.log(jnp.sum(p, axis=1, keepdims=True))
    o_ref[...] = (z - lse).astype(o_ref.dtype)


def gcn_fused(a_p, x_p, w1_p, b1_p, w2_p, b2_p, *, n_valid_cols, vmem_limit):
    n = a_p.shape[0]
    f = x_p.shape[1]
    h1 = w1_p.shape[1]
    h2 = w2_p.shape[1]
    kernel = functools.partial(_fused_kernel, n_valid_cols=n_valid_cols)
    return pl.pallas_call(
        kernel,
        out_shape=jax.ShapeDtypeStruct((n, h2), jnp.float32),
        grid_spec=pltpu.PrefetchScalarGridSpec(
            num_scalar_prefetch=0,
            grid=(1,),
            in_specs=[
                pl.BlockSpec((n, n), lambda i: (0, 0)),
                pl.BlockSpec((n, f), lambda i: (0, 0)),
                pl.BlockSpec((f, h1), lambda i: (0, 0)),
                pl.BlockSpec((1, h1), lambda i: (0, 0)),
                pl.BlockSpec((h1, h2), lambda i: (0, 0)),
                pl.BlockSpec((1, h2), lambda i: (0, 0)),
            ],
            out_specs=pl.BlockSpec((n, h2), lambda i: (0, 0)),
        ),
        compiler_params=pltpu.CompilerParams(
            dimension_semantics=("arbitrary",),
            vmem_limit_bytes=vmem_limit,
        ),
    )(a_p, x_p, w1_p, b1_p, w2_p, b2_p)


# --------------------------------------------------------------------------
# Full GCN forward
# --------------------------------------------------------------------------
def gcn_forward(a_hat, x, w1, b1, w2, b2, *, dropout=0.0, fused=None):
    n, nfeat = x.shape
    nhid1 = w1.shape[1]   # 2 * nhid
    nhid2 = w2.shape[1]   # nhid
    vmem_limit = _vmem_limit_bytes()

    # pad to lane/sublane friendly 128-multiples only (no 512-granularity blow-up)
    n_pad = _round_up(n, 128)
    f_pad = _round_up(nfeat, 128)
    h1_pad = _round_up(nhid1, 128)
    h2_pad = _round_up(nhid2, 128)

    # bf16 for MXU operands, f32 biases; all padding is ZERO (see invariants).
    a_p = _pad2(a_hat, n_pad, n_pad, jnp.bfloat16)
    x_p = _pad2(x, n_pad, f_pad, jnp.bfloat16)
    w1_p = _pad2(w1, f_pad, h1_pad, jnp.bfloat16)
    w2_p = _pad2(w2, h1_pad, h2_pad, jnp.bfloat16)
    b1_p = _pad2(jnp.reshape(b1, (1, -1)), 1, h1_pad, jnp.float32)
    b2_p = _pad2(jnp.reshape(b2, (1, -1)), 1, h2_pad, jnp.float32)

    # TODO(synk): fp8 A_hat on v7x / int8 A_hat on v5e-v6e would halve the
    # dominant A_hat HBM traffic but needs an accuracy study; not emitted here.

    if fused is None:
        fused_bytes = (
            4 * (n_pad * n_pad + n_pad * f_pad + f_pad * h1_pad + h1_pad * h2_pad)
            + 4 * n_pad * (2 * h1_pad + 2 * h2_pad))
        fused = fused_bytes <= vmem_limit // 2

    if fused:
        out = gcn_fused(a_p, x_p, w1_p, b1_p, w2_p, b2_p,
                        n_valid_cols=nhid2, vmem_limit=vmem_limit)
        return out[:n, :nhid2]

    # ----- pipelined large-graph path ---------------------------------------
    tm = _pick_tile(n_pad, 1024, min_tiles=2)   # row tiles (parallel, >=2 for v7x)
    tk = _pick_tile(n_pad, 2048)                # contraction tiles (arbitrary)

    tm_t1 = _pick_tile(n_pad, _transform_row_target(f_pad, h1_pad, vmem_limit),
                       min_tiles=2)
    xw1 = feature_transform(x_p, w1_p, tm=tm_t1, vmem_limit=vmem_limit)
    h1 = graph_aggregate(a_p, xw1, b1_p, tm=tm, tk=tk, n_valid_cols=nhid1,
                         activation="relu", out_dtype=jnp.bfloat16,
                         vmem_limit=vmem_limit)

    # dropout: identity in eval mode (reference forward with training=False)
    # TODO(synk): training-mode dropout (pltpu.prng_seed + stateful_bernoulli).

    tm_t2 = _pick_tile(n_pad, _transform_row_target(h1_pad, h2_pad, vmem_limit),
                       min_tiles=2)
    hw2 = feature_transform(h1, w2_p, tm=tm_t2, vmem_limit=vmem_limit)
    out = graph_aggregate(a_p, hw2, b2_p, tm=tm, tk=tk, n_valid_cols=nhid2,
                          activation="log_softmax", out_dtype=jnp.float32,
                          vmem_limit=vmem_limit)
    return out[:n, :nhid2]


# --------------------------------------------------------------------------
# Example inputs / self-test
# --------------------------------------------------------------------------
def build_normalized_adjacency(key, n_nodes):
    # random undirected graph with self-loops, symmetric normalization
    # A_hat = D^{-1/2} A D^{-1/2}, degrees clamped to >= 1 (DGL clamp(min=1))
    r = jax.random.uniform(key, (n_nodes, n_nodes))
    a = (r + r.T > 1.0).astype(jnp.float32)
    a = a * (1.0 - jnp.eye(n_nodes)) + jnp.eye(n_nodes)
    deg = jnp.clip(jnp.sum(a, axis=1), min=1.0)
    d_inv_sqrt = 1.0 / jnp.sqrt(deg)
    return a * d_inv_sqrt[:, None] * d_inv_sqrt[None, :]


def gcn_reference(a_hat, x, w1, b1, w2, b2):
    h1 = jnp.maximum(a_hat @ (x @ w1) + b1[None, :], 0.0)
    h2 = a_hat @ (h1 @ w2) + b2[None, :]
    return jax.nn.log_softmax(h2, axis=1)


def _make_case(key, n, nfeat, nhid):
    ks = jax.random.split(key, 6)
    a_hat = build_normalized_adjacency(ks[0], n)
    x = jax.random.normal(ks[1], (n, nfeat), dtype=jnp.float32)
    w1 = jax.random.normal(ks[2], (nfeat, 2 * nhid), dtype=jnp.float32) / jnp.sqrt(
        float(nfeat))
    b1 = 0.1 * jax.random.normal(ks[3], (2 * nhid,), dtype=jnp.float32)
    w2 = jax.random.normal(ks[4], (2 * nhid, nhid), dtype=jnp.float32) / jnp.sqrt(
        float(2 * nhid))
    b2 = 0.1 * jax.random.normal(ks[5], (nhid,), dtype=jnp.float32)
    return a_hat, x, w1, b1, w2, b2


if __name__ == "__main__":
    key = jax.random.PRNGKey(0)
    k1, k2 = jax.random.split(key)

    # Case A: tiny graph -> fused single-call path (A_hat read from HBM once).
    args_a = _make_case(k1, 8, 16, 8)
    out_a = jax.block_until_ready(gcn_forward(*args_a, dropout=0.5))
    ref_a = gcn_reference(*args_a)
    assert out_a.shape == (8, 8)
    assert bool(jnp.all(jnp.abs(jnp.sum(jnp.exp(out_a), axis=1) - 1.0) < 1e-3))
    err_a = float(jnp.max(jnp.abs(out_a - ref_a)))
    assert err_a < 7e-2, err_a

    # Case B: mid-size graph forced onto the pipelined multi-call path
    # (128-granular padding, resident XW panel, in-place log_softmax acc).
    args_b = _make_case(k2, 300, 48, 16)
    out_b = jax.block_until_ready(gcn_forward(*args_b, dropout=0.5, fused=False))
    ref_b = gcn_reference(*args_b)
    assert out_b.shape == (300, 16)
    assert bool(jnp.all(jnp.abs(jnp.sum(jnp.exp(out_b), axis=1) - 1.0) < 1e-3))
    err_b = float(jnp.max(jnp.abs(out_b - ref_b)))
    assert err_b < 1e-1, err_b

    print("KERNEL_OK")
</pallas_src>

<mosaic_0001>
module attributes {stable_mosaic.version = 11 : i64} {
  func.func @_fused_kernel(%arg0: i32, %arg1: memref<128x128xbf16, #tpu.memory_space<vmem>>, %arg2: memref<128x128xbf16, #tpu.memory_space<vmem>>, %arg3: memref<128x128xbf16, #tpu.memory_space<vmem>>, %arg4: memref<1x128xf32, #tpu.memory_space<vmem>>, %arg5: memref<128x128xbf16, #tpu.memory_space<vmem>>, %arg6: memref<1x128xf32, #tpu.memory_space<vmem>>, %arg7: memref<128x128xf32, #tpu.memory_space<vmem>>) attributes {dimension_semantics = [#tpu.dimension_semantics<arbitrary>], iteration_bounds = array<i64: 1>, scalar_prefetch = 0 : i64, scratch_operands = 0 : i64, tpu.core_type = #tpu.core_type<tc>, window_params = [{pipeline_mode = #tpu.pipeline_mode<synchronous>, transform_indices = @transform_0, window_bounds = array<i64: 128, 128>}, {pipeline_mode = #tpu.pipeline_mode<synchronous>, transform_indices = @transform_1, window_bounds = array<i64: 128, 128>}, {pipeline_mode = #tpu.pipeline_mode<synchronous>, transform_indices = @transform_2, window_bounds = array<i64: 128, 128>}, {pipeline_mode = #tpu.pipeline_mode<synchronous>, transform_indices = @transform_3, window_bounds = array<i64: 1, 128>}, {pipeline_mode = #tpu.pipeline_mode<synchronous>, transform_indices = @transform_4, window_bounds = array<i64: 128, 128>}, {pipeline_mode = #tpu.pipeline_mode<synchronous>, transform_indices = @transform_5, window_bounds = array<i64: 1, 128>}, {pipeline_mode = #tpu.pipeline_mode<synchronous>, transform_indices = @transform_6, window_bounds = array<i64: 128, 128>}]} {
    %c0 = arith.constant 0 : index
    %c0_0 = arith.constant 0 : index
    %0 = vector.load %arg1[%c0, %c0_0] : memref<128x128xbf16, #tpu.memory_space<vmem>>, vector<128x128xbf16>
    %c0_1 = arith.constant 0 : index
    %c0_2 = arith.constant 0 : index
    %1 = vector.load %arg2[%c0_1, %c0_2] : memref<128x128xbf16, #tpu.memory_space<vmem>>, vector<128x128xbf16>
    %c0_3 = arith.constant 0 : index
    %c0_4 = arith.constant 0 : index
    %2 = vector.load %arg3[%c0_3, %c0_4] : memref<128x128xbf16, #tpu.memory_space<vmem>>, vector<128x128xbf16>
    %cst = arith.constant dense<0.000000e+00> : vector<128x128xf32>
    %3 = tpu.matmul %1, %2, %cst {dimension_numbers = #tpu.dot_dimension_numbers<[1], [0], [0], [1], [0, 0, 1, 1], [], []>} : vector<128x128xbf16>, vector<128x128xbf16>, vector<128x128xf32> -> vector<128x128xf32>
    %4 = arith.truncf %3 : vector<128x128xf32> to vector<128x128xbf16>
    %cst_5 = arith.constant dense<0.000000e+00> : vector<128x128xf32>
    %5 = tpu.matmul %0, %4, %cst_5 {dimension_numbers = #tpu.dot_dimension_numbers<[1], [0], [0], [1], [0, 0, 1, 1], [], []>} : vector<128x128xbf16>, vector<128x128xbf16>, vector<128x128xf32> -> vector<128x128xf32>
    %c0_6 = arith.constant 0 : index
    %c0_7 = arith.constant 0 : index
    %6 = vector.load %arg4[%c0_6, %c0_7] : memref<1x128xf32, #tpu.memory_space<vmem>>, vector<1x128xf32>
    %7 = vector.broadcast %6 : vector<1x128xf32> to vector<128x128xf32>
    %8 = arith.addf %5, %7 : vector<128x128xf32>
    %cst_8 = arith.constant 0.000000e+00 : f32
    %9 = vector.broadcast %cst_8 : f32 to vector<128x128xf32>
    %10 = arith.maximumf %8, %9 : vector<128x128xf32>
    %11 = arith.truncf %10 : vector<128x128xf32> to vector<128x128xbf16>
    %c0_9 = arith.constant 0 : index
    %c0_10 = arith.constant 0 : index
    %12 = vector.load %arg5[%c0_9, %c0_10] : memref<128x128xbf16, #tpu.memory_space<vmem>>, vector<128x128xbf16>
    %cst_11 = arith.constant dense<0.000000e+00> : vector<128x128xf32>
    %13 = tpu.matmul %11, %12, %cst_11 {dimension_numbers = #tpu.dot_dimension_numbers<[1], [0], [0], [1], [0, 0, 1, 1], [], []>} : vector<128x128xbf16>, vector<128x128xbf16>, vector<128x128xf32> -> vector<128x128xf32>
    %14 = arith.truncf %13 : vector<128x128xf32> to vector<128x128xbf16>
    %cst_12 = arith.constant dense<0.000000e+00> : vector<128x128xf32>
    %15 = tpu.matmul %0, %14, %cst_12 {dimension_numbers = #tpu.dot_dimension_numbers<[1], [0], [0], [1], [0, 0, 1, 1], [], []>} : vector<128x128xbf16>, vector<128x128xbf16>, vector<128x128xf32> -> vector<128x128xf32>
    %c0_13 = arith.constant 0 : index
    %c0_14 = arith.constant 0 : index
    %16 = vector.load %arg6[%c0_13, %c0_14] : memref<1x128xf32, #tpu.memory_space<vmem>>, vector<1x128xf32>
    %17 = vector.broadcast %16 : vector<1x128xf32> to vector<128x128xf32>
    %18 = arith.addf %15, %17 : vector<128x128xf32>
    %19 = tpu.iota {dimensions = array<i32: 1>} : vector<128x128xi32>
    %c8_i32 = arith.constant 8 : i32
    %20 = vector.broadcast %c8_i32 : i32 to vector<128x128xi32>
    %21 = arith.cmpi slt, %19, %20 : vector<128x128xi32>
    %cst_15 = arith.constant 0xFF800000 : f32
    %22 = vector.broadcast %cst_15 : f32 to vector<128x128xf32>
    %23 = arith.select %21, %18, %22 : vector<128x128xi1>, vector<128x128xf32>
    %cst_16 = arith.constant dense<0xFF800000> : vector<128xf32>
    %24 = vector.multi_reduction <maximumf>, %23, %cst_16 [1] : vector<128x128xf32> to vector<128xf32>
    %25 = vector.shape_cast %24 : vector<128xf32> to vector<128x1xf32>
    %26 = vector.broadcast %25 : vector<128x1xf32> to vector<128x128xf32>
    %27 = arith.subf %18, %26 : vector<128x128xf32>
    %28 = math.exp %27 : vector<128x128xf32>
    %cst_17 = arith.constant 0.000000e+00 : f32
    %29 = vector.broadcast %cst_17 : f32 to vector<128x128xf32>
    %30 = arith.select %21, %28, %29 : vector<128x128xi1>, vector<128x128xf32>
    %cst_18 = arith.constant dense<0.000000e+00> : vector<128xf32>
    %31 = vector.multi_reduction <add>, %30, %cst_18 [1] : vector<128x128xf32> to vector<128xf32>
    %32 = vector.shape_cast %31 : vector<128xf32> to vector<128x1xf32>
    %33 = math.log %32 : vector<128x1xf32>
    %34 = vector.broadcast %33 : vector<128x1xf32> to vector<128x128xf32>
    %35 = arith.subf %27, %34 : vector<128x128xf32>
    %c0_19 = arith.constant 0 : index
    %c0_20 = arith.constant 0 : index
    %36 = vector.load %arg7[%c0_19, %c0_20] : memref<128x128xf32, #tpu.memory_space<vmem>>, vector<128x128xf32>
    tpu.vector_store %arg7[%c0_19, %c0_20], %35 {strides = array<i32>} : memref<128x128xf32, #tpu.memory_space<vmem>>, vector<128x128xf32>,
    return
  }
  func.func @transform_0(%arg0: i32) -> (i32, i32) {
    %c0_i32 = arith.constant 0 : i32
    %c0_i32_0 = arith.constant 0 : i32
    %c0_i32_1 = arith.constant 0 : i32
    return %c0_i32, %c0_i32_0 : i32, i32
  }
  func.func @transform_1(%arg0: i32) -> (i32, i32) {
    %c0_i32 = arith.constant 0 : i32
    %c0_i32_0 = arith.constant 0 : i32
    %c0_i32_1 = arith.constant 0 : i32
    return %c0_i32, %c0_i32_0 : i32, i32
  }
  func.func @transform_2(%arg0: i32) -> (i32, i32) {
    %c0_i32 = arith.constant 0 : i32
    %c0_i32_0 = arith.constant 0 : i32
    %c0_i32_1 = arith.constant 0 : i32
    return %c0_i32, %c0_i32_0 : i32, i32
  }
  func.func @transform_3(%arg0: i32) -> (i32, i32) {
    %c0_i32 = arith.constant 0 : i32
    %c0_i32_0 = arith.constant 0 : i32
    %c0_i32_1 = arith.constant 0 : i32
    return %c0_i32, %c0_i32_0 : i32, i32
  }
  func.func @transform_4(%arg0: i32) -> (i32, i32) {
    %c0_i32 = arith.constant 0 : i32
    %c0_i32_0 = arith.constant 0 : i32
    %c0_i32_1 = arith.constant 0 : i32
    return %c0_i32, %c0_i32_0 : i32, i32
  }
  func.func @transform_5(%arg0: i32) -> (i32, i32) {
    %c0_i32 = arith.constant 0 : i32
    %c0_i32_0 = arith.constant 0 : i32
    %c0_i32_1 = arith.constant 0 : i32
    return %c0_i32, %c0_i32_0 : i32, i32
  }
  func.func @transform_6(%arg0: i32) -> (i32, i32) {
    %c0_i32 = arith.constant 0 : i32
    %c0_i32_0 = arith.constant 0 : i32
    %c0_i32_1 = arith.constant 0 : i32
    return %c0_i32, %c0_i32_0 : i32, i32
  }
}

</mosaic_0001>

<bundles_post_ra>
// kernel: tpu_custom_call.1
= control target key start
LH: loop header
LB: loop body
LE: loop exit
PB: predicated region body
PF: predicated region fallthrough
CT: control target
= control target key end

     0   :  { %11 = vsyncpa [#allocation3], 0  ;;  %s1820_s0 = inlined_call_operand.hbm [shape: bf16[128,128], index: 0, kind: input, shape index: {}]   ;;  %s1821_s1 = inlined_call_operand.hbm [shape: bf16[128,128], index: 1, kind: input, shape index: {}]   ;;  %s1822_s2 = inlined_call_operand.hbm [shape: bf16[128,128], index: 2, kind: input, shape index: {}]   ;;  %s1823_s3 = inlined_call_operand.vmem [shape: f32[1,128], index: 3, kind: input, shape index: {}]   ;;  %s1824_s4 = inlined_call_operand.hbm [shape: bf16[128,128], index: 4, kind: input, shape index: {}]   ;;  %s1825_s5 = inlined_call_operand.vmem [shape: f32[1,128], index: 5, kind: input, shape index: {}]   ;;  %s1826_s6 = inlined_call_operand.hbm [shape: f32[128,128], index: 6, kind: output, shape index: {}]  }
   0x1   :  { %12 = vsyncpa [#allocation6], 0 }
   0x2   :  { %13 = vsyncpa [#allocation9], 0 }
   0x3   :  { %14 = vsyncpa [#allocation4], 0  ;;  %s1457_s21 = smov [#allocation5]   ;;  %s1458_s23 = smov [#allocation2]  }
   0x4   :  { %s32_s22 = sshll.u32 %s1457_s21, 4  ;;  %s20_s24 = sshll.u32 %s1458_s23, 4  ;;  %s33_s22 = int_to_ptr.vmem [resolvable:$true] %s32_s22  ;;  %s1501_s24 = int_to_ptr.vmem [resolvable:$true] %s20_s24 }
   0x5   :  { %s1339_s27 = scalar_lea.hbm %s1821_s1, 1024 }
   0x6   :  { %p1340_p0 = scmp.ne.s32.totalorder %s1821_s1, %s1339_s27  ;;  %p1343_p1 = scmp.lt.u32.totalorder %s1339_s27, %s1821_s1 }
   0x8   :  { %p1345_p2 = pnand %p1343_p1, %p1340_p0 }
   0xa   :  { %1348 = shalt.err (!%p1345_p2)
}
   0xb   :  { %s1349_s8 = scalar_lea.vmem %s33_s22, 1024  ;;  %p1354_p4 = scmp.lt.s32.totalorder %s33_s22, %s33_s22 }
   0xc   :  { %p1350_p3 = scmp.ne.s32.totalorder %s33_s22, %s1349_s8  ;;  %p1355_p5 = scmp.lt.s32.totalorder %s1349_s8, %s1349_s8 }
   0xe   :  { %p1356_p6 = por %p1355_p5, %p1354_p4 }
  0x10   :  { %p1357_p7 = pnand %p1356_p6, %p1350_p3 }
  0x12   :  { %1360 = shalt.err (!%p1357_p7)
}
  0x13   :  { %s1459_s9 = smov 64   ;;  %s1460_s10 = smov 4  }
  0x14   :  { %38 = dma.hbm_to_vmem [thread:$0]  %s1821_s1, 1024, %s33_s22, [#allocation6], %s1459_s9, %s1459_s9, %s1460_s10  }
  0x15   :  { %s1361_s15 = scalar_lea.hbm %s1820_s0, 1024 }
  0x16   :  { %p1362_p8 = scmp.ne.s32.totalorder %s1820_s0, %s1361_s15  ;;  %p1365_p9 = scmp.lt.u32.totalorder %s1361_s15, %s1820_s0 }
  0x18   :  { %p1367_p10 = pnand %p1365_p9, %p1362_p8 }
  0x1a   :  { %1370 = shalt.err (!%p1367_p10)
}
  0x1b   :  { %s1371_s20 = scalar_lea.vmem %s1501_s24, 1024  ;;  %p1376_p12 = scmp.lt.s32.totalorder %s1501_s24, %s1501_s24 }
  0x1c   :  { %p1372_p11 = scmp.ne.s32.totalorder %s1501_s24, %s1371_s20  ;;  %p1377_p13 = scmp.lt.s32.totalorder %s1371_s20, %s1371_s20 }
  0x1e   :  { %p1378_p0 = por %p1377_p13, %p1376_p12 }
  0x20   :  { %p1379_p1 = pnand %p1378_p0, %p1372_p11 }
  0x22   :  { %1382 = shalt.err (!%p1379_p1)
}
  0x23   :  { %26 = dma.hbm_to_vmem [thread:$0]  %s1820_s0, 1024, %s1501_s24, [#allocation3], %s1459_s9, %s1459_s9, %s1460_s10  }
  0x24   :  { %s1461_s22 = smov [#allocation7]   ;;  %s1462_s25 = smov [#allocation8]  }
  0x25   :  { %s44_s23 = sshll.u32 %s1461_s22, 4  ;;  %s58_s26 = sshll.u32 %s1462_s25, 4  ;;  %s45_s23 = int_to_ptr.vmem [resolvable:$true] %s44_s23  ;;  %s1538_s26 = int_to_ptr.vmem [resolvable:$true] %s58_s26 }
  0x26   :  { %s1383_s29 = scalar_lea.hbm %s1822_s2, 1024 }
  0x27   :  { %p1384_p2 = scmp.ne.s32.totalorder %s1822_s2, %s1383_s29  ;;  %p1387_p3 = scmp.lt.u32.totalorder %s1383_s29, %s1822_s2 }
  0x29   :  { %p1389_p4 = pnand %p1387_p3, %p1384_p2 }
  0x2b   :  { %1392 = shalt.err (!%p1389_p4)
}
  0x2c   :  { %s1393_s0 = scalar_lea.vmem %s45_s23, 1024  ;;  %p1398_p6 = scmp.lt.s32.totalorder %s45_s23, %s45_s23 }
  0x2d   :  { %p1394_p5 = scmp.ne.s32.totalorder %s45_s23, %s1393_s0  ;;  %p1399_p7 = scmp.lt.s32.totalorder %s1393_s0, %s1393_s0 }
  0x2f   :  { %p1400_p8 = por %p1399_p7, %p1398_p6 }
  0x31   :  { %p1401_p9 = pnand %p1400_p8, %p1394_p5 }
  0x33   :  { %1404 = shalt.err (!%p1401_p9)
}
  0x34   :  { %50 = dma.hbm_to_vmem [thread:$0]  %s1822_s2, 1024, %s45_s23, [#allocation6], %s1459_s9, %s1459_s9, %s1460_s10  }
  0x35   :  { %s1405_s15 = scalar_lea.hbm %s1824_s4, 1024 }
  0x36   :  { %p1406_p10 = scmp.ne.s32.totalorder %s1824_s4, %s1405_s15  ;;  %p1409_p11 = scmp.lt.u32.totalorder %s1405_s15, %s1824_s4 }
  0x38   :  { %p1411_p12 = pnand %p1409_p11, %p1406_p10 }
  0x3a   :  { %1414 = shalt.err (!%p1411_p12)
}
  0x3b   :  { %s1415_s20 = scalar_lea.vmem %s1538_s26, 1024  ;;  %p1420_p0 = scmp.lt.s32.totalorder %s1538_s26, %s1538_s26 }
  0x3c   :  { %p1416_p13 = scmp.ne.s32.totalorder %s1538_s26, %s1415_s20  ;;  %p1421_p1 = scmp.lt.s32.totalorder %s1415_s20, %s1415_s20 }
  0x3e   :  { %p1422_p2 = por %p1421_p1, %p1420_p0 }
  0x40   :  { %p1423_p3 = pnand %p1422_p2, %p1416_p13 }
  0x42   :  { %1426 = shalt.err (!%p1423_p3)
}
  0x43   :  { %64 = dma.hbm_to_vmem [thread:$0]  %s1824_s4, 1024, %s1538_s26, [#allocation9], %s1459_s9, %s1459_s9, %s1460_s10  }
  0x44   :  { %1449 = dma.done.wait [#allocation3], 1024  }
  0x45   :  { %1450 = vsyncadd [#allocation3], 4294966272 }
  0x46   :  { %1451 = dma.done.wait [#allocation6], 2048  }
  0x47   :  { %1452 = vsyncadd [#allocation6], 4294965248 }
  0x48   :  { %1453 = dma.done.wait [#allocation9], 1024  }
  0x49   :  { %1454 = vsyncadd [#allocation9], 4294966272  ;;  %v1243_v0 = vld [vmem:[#allocation7] sm:$0xff]   ;;  %v1244_v1 = vld [vmem:[#allocation7 + $0x8] sm:$0xff]  }
  0x4a   :  { %1106 = vmatprep.subr.bf16.mxu0 %v1243_v0  ;;  %v1245_v2 = vld [vmem:[#allocation7 + $0x10] sm:$0xff]   ;;  %v1246_v3 = vld [vmem:[#allocation7 + $0x18] sm:$0xff]   ;;  %v1251_v4 = vld [vmem:[#allocation5] sm:$0xff]  }
  0x4b   :  { %1107 = vmatpush3.bf16.msra.mxu0 %v1243_v0  ;;  %1122 = vmatprep.mubr.bf16.mxu0 %v1251_v4  ;;  %v1247_v5 = vld [vmem:[#allocation7 + $0x20] sm:$0xff]   ;;  %v1248_v6 = vld [vmem:[#allocation7 + $0x28] sm:$0xff]   ;;  %v1249_v7 = vld [vmem:[#allocation7 + $0x30] sm:$0xff]  }
  0x4c   :  { %1108 = vmatprep.subr.bf16.mxu0 %v1244_v1  ;;  %v1250_v8 = vld [vmem:[#allocation7 + $0x38] sm:$0xff]   ;;  %v1252_v9 = vld [vmem:[#allocation5 + $0x8] sm:$0xff]   ;;  %v1253_v10 = vld [vmem:[#allocation5 + $0x10] sm:$0xff]  }
  0x4d   :  { %v1254_v11 = vld [vmem:[#allocation5 + $0x18] sm:$0xff]   ;;  %v1255_v12 = vld [vmem:[#allocation5 + $0x20] sm:$0xff]   ;;  %v1256_v13 = vld [vmem:[#allocation5 + $0x28] sm:$0xff]  }
  0x4e   :  { %v1257_v14 = vld [vmem:[#allocation5 + $0x30] sm:$0xff]   ;;  %v1258_v15 = vld [vmem:[#allocation5 + $0x38] sm:$0xff]   ;;  %v1575_v16 = vld [vmem:[#allocation2] sm:$0xff]  }
  0x4f   :  { %1109 = vmatpush3.bf16.msra.mxu0 %v1244_v1  ;;  %1154 = vmatprep.mubr.bf16.mxu1 %v1575_v16  ;;  %v1267_v17 = vld [vmem:[#allocation8] sm:$0xff]   ;;  %v1268_v18 = vld [vmem:[#allocation8 + $0x8] sm:$0xff]   ;;  %v1269_v19 = vld [vmem:[#allocation8 + $0x10] sm:$0xff]  }
  0x50   :  { %1110 = vmatprep.subr.bf16.mxu0 %v1245_v2  ;;  %v1270_v20 = vld [vmem:[#allocation8 + $0x18] sm:$0xff]   ;;  %v1271_v21 = vld [vmem:[#allocation8 + $0x20] sm:$0xff]   ;;  %v1272_v22 = vld [vmem:[#allocation8 + $0x28] sm:$0xff]  }
  0x51   :  { %v1578_v47 = vld [vmem:[#allocation2 + $0x8] sm:$0xff]   ;;  %v1580_v48 = vld [vmem:[#allocation2 + $0x10] sm:$0xff]   ;;  %v1584_v49 = vld [vmem:[#allocation2 + $0x18] sm:$0xff]  }
  0x52   :  { %v1586_v50 = vld [vmem:[#allocation2 + $0x20] sm:$0xff]   ;;  %v1590_v51 = vld [vmem:[#allocation2 + $0x28] sm:$0xff]   ;;  %v1592_v52 = vld [vmem:[#allocation2 + $0x30] sm:$0xff]  }
  0x53   :  { %1111 = vmatpush3.bf16.msra.mxu0 %v1245_v2  ;;  %v1596_v53 = vld [vmem:[#allocation2 + $0x38] sm:$0xff]   ;;  %v1273_v54 = vld [vmem:[#allocation8 + $0x30] sm:$0xff]   ;;  %v1024_v56 = vld [vmem:[%s1823_s3] ss:$0 sm:$0xff] }
  0x54   :  { %1112 = vmatprep.subr.bf16.mxu0 %v1246_v3  ;;  %v1274_v55 = vld [vmem:[#allocation8 + $0x38] sm:$0xff]  }
  0x57   :  { %1113 = vmatpush3.bf16.msra.mxu0 %v1246_v3 }
  0x58   :  { %1114 = vmatprep.subr.bf16.mxu0 %v1247_v5 }
  0x5b   :  { %1115 = vmatpush3.bf16.msra.mxu0 %v1247_v5 }
  0x5c   :  { %1116 = vmatprep.subr.bf16.mxu0 %v1248_v6 }
  0x5f   :  { %1117 = vmatpush3.bf16.msra.mxu0 %v1248_v6 }
  0x60   :  { %1118 = vmatprep.subr.bf16.mxu0 %v1249_v7 }
  0x63   :  { %1119 = vmatpush3.bf16.msra.mxu0 %v1249_v7 }
  0x64   :  { %1120 = vmatprep.subr.bf16.mxu0 %v1250_v8 }
  0x67   :  { %1121 = vmatpush3.bf16.msra.mxu0 %v1250_v8 }
  0x68   :  { %1170 = vmatprep.subr.bf16.mxu0 %v1267_v17 }
  0x6a   :  { %1123 = vmatmul.mubr.bf16.vlgmr.msra.gmra.mrb[0].mxu0 %v1252_v9 }
  0x6b   :  { %1126 = vmatprep.mubr.bf16.mxu0 %v1253_v10  ;;  %1171 = vmatpush3.bf16.msra.mxu0 %v1267_v17 }
  0x6c   :  { %1172 = vmatprep.subr.bf16.mxu0 %v1268_v18 }
  0x6f   :  { %1173 = vmatpush3.bf16.msra.mxu0 %v1268_v18 }
  0x70   :  { %1174 = vmatprep.subr.bf16.mxu0 %v1269_v19 }
  0x72   :  { %1127 = vmatmul.mubr.bf16.gmra.mrb[4].mxu0 %v1254_v11 }
  0x73   :  { %1130 = vmatprep.mubr.bf16.mxu0 %v1255_v12  ;;  %1175 = vmatpush3.bf16.msra.mxu0 %v1269_v19 }
  0x74   :  { %1176 = vmatprep.subr.bf16.mxu0 %v1270_v20 }
  0x77   :  { %1177 = vmatpush3.bf16.msra.mxu0 %v1270_v20 }
  0x78   :  { %1178 = vmatprep.subr.bf16.mxu0 %v1271_v21 }
  0x7a   :  { %1131 = vmatmul.mubr.bf16.gmra.mrb[8].mxu0 %v1256_v13 }
  0x7b   :  { %1134 = vmatprep.mubr.bf16.mxu0 %v1257_v14  ;;  %1179 = vmatpush3.bf16.msra.mxu0 %v1271_v21 }
  0x7c   :  { %1180 = vmatprep.subr.bf16.mxu0 %v1272_v22 }
  0x7f   :  { %1181 = vmatpush3.bf16.msra.mxu0 %v1272_v22 }
  0x80   :  { %1182 = vmatprep.subr.bf16.mxu0 %v1273_v54 }
  0x82   :  { %1135 = vmatmul.mubr.bf16.gmra.mrb[12].mxu0 %v1258_v15 }
  0x83   :  { %1183 = vmatpush3.bf16.msra.mxu0 %v1273_v54 }
  0x84   :  { %1184 = vmatprep.subr.bf16.mxu0 %v1274_v55 }
  0x87   :  { %1185 = vmatpush3.bf16.msra.mxu0 %v1274_v55 }
 0x13d   :  { %v1124_v23 = vpop.f32.mrb[0].mxu0 }
 0x13e   :  { %v258_v24 = vpop.f32.mrb[1].mxu0 }
 0x13f   :  { %v1125_v25 = vpop.f32.mrb[2].mxu0 }
 0x140   :  { %v322_v26 = vpack.c.bf16 %v1125_v25, %v1124_v23  ;;  %v261_v27 = vpop.f32.mrb[3].mxu0 }
 0x141   :  { %v321_v28 = vpack.c.bf16 %v261_v27, %v258_v24 }
 0x143   :  { %1138 = vmatprep.subr.bf16.mxu1 %v321_v28 }
 0x144   :  { %1139 = vmatpush3.bf16.msra.mxu1 %v321_v28 }
 0x145   :  { %v1128_v29 = vpop.f32.mrb[4].mxu0  ;;  %1140 = vmatprep.subr.bf16.mxu1 %v322_v26 }
 0x146   :  { %v274_v30 = vpop.f32.mrb[5].mxu0 }
 0x147   :  { %v1129_v31 = vpop.f32.mrb[6].mxu0 }
 0x148   :  { %v324_v32 = vpack.c.bf16 %v1129_v31, %v1128_v29  ;;  %v277_v33 = vpop.f32.mrb[7].mxu0  ;;  %1141 = vmatpush3.bf16.msra.mxu1 %v322_v26 }
 0x149   :  { %v323_v34 = vpack.c.bf16 %v277_v33, %v274_v30 }
 0x14b   :  { %1142 = vmatprep.subr.bf16.mxu1 %v323_v34 }
 0x14c   :  { %1143 = vmatpush3.bf16.msra.mxu1 %v323_v34 }
 0x14d   :  { %v1132_v35 = vpop.f32.mrb[8].mxu0  ;;  %1144 = vmatprep.subr.bf16.mxu1 %v324_v32 }
 0x14e   :  { %v290_v36 = vpop.f32.mrb[9].mxu0 }
 0x14f   :  { %v1133_v37 = vpop.f32.mrb[10].mxu0 }
 0x150   :  { %v326_v38 = vpack.c.bf16 %v1133_v37, %v1132_v35  ;;  %v293_v39 = vpop.f32.mrb[11].mxu0  ;;  %1145 = vmatpush3.bf16.msra.mxu1 %v324_v32 }
 0x151   :  { %v325_v40 = vpack.c.bf16 %v293_v39, %v290_v36 }
 0x153   :  { %1146 = vmatprep.subr.bf16.mxu1 %v325_v40 }
 0x154   :  { %1147 = vmatpush3.bf16.msra.mxu1 %v325_v40 }
 0x155   :  { %v1136_v41 = vpop.f32.mrb[12].mxu0  ;;  %1148 = vmatprep.subr.bf16.mxu1 %v326_v38 }
 0x156   :  { %v306_v42 = vpop.f32.mrb[13].mxu0 }
 0x157   :  { %v1137_v43 = vpop.f32.mrb[14].mxu0 }
 0x158   :  { %v328_v44 = vpack.c.bf16 %v1137_v43, %v1136_v41  ;;  %v309_v45 = vpop.f32.mrb[15].mxu0  ;;  %1149 = vmatpush3.bf16.msra.mxu1 %v326_v38 }
 0x159   :  { %v327_v46 = vpack.c.bf16 %v309_v45, %v306_v42 }
 0x15b   :  { %1150 = vmatprep.subr.bf16.mxu1 %v327_v46 }
 0x15c   :  { %1151 = vmatpush3.bf16.msra.mxu1 %v327_v46 }
 0x15d   :  { %1152 = vmatprep.subr.bf16.mxu1 %v328_v44 }
 0x160   :  { %1153 = vmatpush3.bf16.msra.mxu1 %v328_v44 }
 0x163   :  { %1155 = vmatmul.mubr.bf16.vlgmr.msra.gmra.mrb[0].mxu1 %v1578_v47 }
 0x164   :  { %1158 = vmatprep.mubr.bf16.mxu1 %v1580_v48 }
 0x16b   :  { %1159 = vmatmul.mubr.bf16.gmra.mrb[4].mxu1 %v1584_v49 }
 0x16c   :  { %1162 = vmatprep.mubr.bf16.mxu1 %v1586_v50 }
 0x173   :  { %1163 = vmatmul.mubr.bf16.gmra.mrb[8].mxu1 %v1590_v51 }
 0x174   :  { %1166 = vmatprep.mubr.bf16.mxu1 %v1592_v52 }
 0x17b   :  { %1167 = vmatmul.mubr.bf16.gmra.mrb[12].mxu1 %v1596_v53 }
 0x17c   :  { %1218 = vmatprep.mubr.bf16.mxu1 %v1575_v16 }
 0x236   :  { %v1156_v57 = vpop.f32.mrb[0].mxu1 }
 0x237   :  { %v427_v58 = vadd.f32 %v1156_v57, %v1024_v56  ;;  %v418_v59 = vpop.f32.mrb[1].mxu1 }
 0x238   :  { %v419_v60 = vadd.f32 %v1024_v56, %v418_v59  ;;  %v1157_v61 = vpop.f32.mrb[2].mxu1 }
 0x239   :  { %v430_v62 = vadd.f32 %v1157_v61, %v1024_v56  ;;  %v421_v63 = vpop.f32.mrb[3].mxu1  ;;  %v483_v1 = vmax.f32 %v427_v58, 0.0 }
 0x23a   :  { %v422_v0 = vadd.f32 %v1024_v56, %v421_v63  ;;  %v481_v3 = vmax.f32 %v419_v60, 0.0 }
 0x23b   :  { %v484_v2 = vmax.f32 %v430_v62, 0.0 }
 0x23c   :  { %v482_v4 = vmax.f32 %v422_v0, 0.0 }
 0x23d   :  { %v498_v5 = vpack.c.bf16 %v484_v2, %v483_v1 }
 0x23e   :  { %v497_v6 = vpack.c.bf16 %v482_v4, %v481_v3  ;;  %v1160_v7 = vpop.f32.mrb[4].mxu1 }
 0x23f   :  { %v443_v8 = vadd.f32 %v1160_v7, %v1024_v56  ;;  %v434_v9 = vpop.f32.mrb[5].mxu1 }
 0x240   :  { %v435_v10 = vadd.f32 %v1024_v56, %v434_v9  ;;  %v1161_v11 = vpop.f32.mrb[6].mxu1  ;;  %1186 = vmatprep.mubr.bf16.mxu0 %v497_v6 }
 0x241   :  { %v446_v12 = vadd.f32 %v1161_v11, %v1024_v56  ;;  %v437_v13 = vpop.f32.mrb[7].mxu1  ;;  %1187 = vmatmul.mubr.bf16.vlgmr.msra.gmra.mrb[16].mxu0 %v498_v5  ;;  %v487_v15 = vmax.f32 %v443_v8, 0.0 }
 0x242   :  { %v438_v14 = vadd.f32 %v1024_v56, %v437_v13  ;;  %v485_v17 = vmax.f32 %v435_v10, 0.0 }
 0x243   :  { %v488_v16 = vmax.f32 %v446_v12, 0.0 }
 0x244   :  { %v486_v18 = vmax.f32 %v438_v14, 0.0 }
 0x245   :  { %v500_v19 = vpack.c.bf16 %v488_v16, %v487_v15  ;;  %v778_v16 = vlaneseq }
 0x246   :  { %v499_v20 = vpack.c.bf16 %v486_v18, %v485_v17  ;;  %v1164_v21 = vpop.f32.mrb[8].mxu1  ;;  %v1041_v18 = vld [vmem:[%s1825_s5] ss:$0 sm:$0xff]  ;;  %s1463_s5 = smov [#allocation10]  }
 0x247   :  { %v459_v22 = vadd.f32 %v1164_v21, %v1024_v56  ;;  %v450_v23 = vpop.f32.mrb[9].mxu1  ;;  %v1610_v17 = vand.u32 127, %v778_v16  ;;  %s994_s21 = sshll.u32 %s1463_s5, 4  ;;  %s995_s21 = int_to_ptr.vmem [resolvable:$true] %s994_s21 }
 0x248   :  { %v451_v24 = vadd.f32 %v1024_v56, %v450_v23  ;;  %v1165_v25 = vpop.f32.mrb[10].mxu1  ;;  %1190 = vmatprep.mubr.bf16.mxu0 %v499_v20  ;;  %s1427_s22 = scalar_lea.vmem %s995_s21, 2048  ;;  %p1432_p5 = scmp.lt.s32.totalorder %s995_s21, %s995_s21 }
 0x249   :  { %v462_v26 = vadd.f32 %v1165_v25, %v1024_v56  ;;  %v453_v27 = vpop.f32.mrb[11].mxu1  ;;  %1191 = vmatmul.mubr.bf16.gmra.mrb[20].mxu0 %v500_v19  ;;  %v491_v29 = vmax.f32 %v459_v22, 0.0  ;;  %vm780_vm0 = vcmp.lt.s32.totalorder %v1610_v17, 8  ;;  %p1428_p4 = scmp.ne.s32.totalorder %s995_s21, %s1427_s22  ;;  %p1433_p6 = scmp.lt.s32.totalorder %s1427_s22, %s1427_s22 }
 0x24a   :  { %v454_v28 = vadd.f32 %v1024_v56, %v453_v27  ;;  %v489_v31 = vmax.f32 %v451_v24, 0.0 }
 0x24b   :  { %v492_v30 = vmax.f32 %v462_v26, 0.0  ;;  %p1434_p7 = por %p1433_p6, %p1432_p5 }
 0x24c   :  { %v490_v32 = vmax.f32 %v454_v28, 0.0 }
 0x24d   :  { %v502_v33 = vpack.c.bf16 %v492_v30, %v491_v29  ;;  %p1435_p8 = pnand %p1434_p7, %p1428_p4 }
 0x24e   :  { %v501_v34 = vpack.c.bf16 %v490_v32, %v489_v31  ;;  %v1168_v35 = vpop.f32.mrb[12].mxu1 }
 0x24f   :  { %v475_v36 = vadd.f32 %v1168_v35, %v1024_v56  ;;  %v466_v37 = vpop.f32.mrb[13].mxu1 }
 0x250   :  { %v467_v38 = vadd.f32 %v1024_v56, %v466_v37  ;;  %v1169_v39 = vpop.f32.mrb[14].mxu1  ;;  %1194 = vmatprep.mubr.bf16.mxu0 %v501_v34 }
 0x251   :  { %v478_v40 = vadd.f32 %v1169_v39, %v1024_v56  ;;  %v469_v41 = vpop.f32.mrb[15].mxu1  ;;  %1195 = vmatmul.mubr.bf16.gmra.mrb[24].mxu0 %v502_v33  ;;  %v495_v43 = vmax.f32 %v475_v36, 0.0 }
 0x252   :  { %v470_v42 = vadd.f32 %v1024_v56, %v469_v41  ;;  %v493_v45 = vmax.f32 %v467_v38, 0.0 }
 0x253   :  { %v496_v44 = vmax.f32 %v478_v40, 0.0 }
 0x254   :  { %v494_v46 = vmax.f32 %v470_v42, 0.0 }
 0x255   :  { %v504_v54 = vpack.c.bf16 %v496_v44, %v495_v43 }
 0x256   :  { %v503_v55 = vpack.c.bf16 %v494_v46, %v493_v45 }
 0x258   :  { %1198 = vmatprep.mubr.bf16.mxu0 %v503_v55 }
 0x259   :  { %1199 = vmatmul.mubr.bf16.gmra.mrb[28].mxu0 %v504_v54 }
 0x314   :  { %v1188_v57 = vpop.f32.mrb[16].mxu0 }
 0x315   :  { %v603_v58 = vpop.f32.mrb[17].mxu0 }
 0x316   :  { %v1189_v59 = vpop.f32.mrb[18].mxu0 }
 0x317   :  { %v667_v60 = vpack.c.bf16 %v1189_v59, %v1188_v57  ;;  %v606_v61 = vpop.f32.mrb[19].mxu0 }
 0x318   :  { %v666_v62 = vpack.c.bf16 %v606_v61, %v603_v58 }
 0x31a   :  { %1202 = vmatprep.subr.bf16.mxu1 %v666_v62 }
 0x31b   :  { %1203 = vmatpush3.bf16.msra.mxu1 %v666_v62 }
 0x31c   :  { %v1192_v63 = vpop.f32.mrb[20].mxu0  ;;  %1204 = vmatprep.subr.bf16.mxu1 %v667_v60 }
 0x31d   :  { %v619_v0 = vpop.f32.mrb[21].mxu0 }
 0x31e   :  { %v1193_v56 = vpop.f32.mrb[22].mxu0 }
 0x31f   :  { %v669_v1 = vpack.c.bf16 %v1193_v56, %v1192_v63  ;;  %v622_v2 = vpop.f32.mrb[23].mxu0  ;;  %1205 = vmatpush3.bf16.msra.mxu1 %v667_v60 }
 0x320   :  { %v668_v3 = vpack.c.bf16 %v622_v2, %v619_v0 }
 0x322   :  { %1206 = vmatprep.subr.bf16.mxu1 %v668_v3 }
 0x323   :  { %1207 = vmatpush3.bf16.msra.mxu1 %v668_v3 }
 0x324   :  { %v1196_v4 = vpop.f32.mrb[24].mxu0  ;;  %1208 = vmatprep.subr.bf16.mxu1 %v669_v1 }
 0x325   :  { %v635_v5 = vpop.f32.mrb[25].mxu0 }
 0x326   :  { %v1197_v6 = vpop.f32.mrb[26].mxu0 }
 0x327   :  { %v671_v7 = vpack.c.bf16 %v1197_v6, %v1196_v4  ;;  %v638_v8 = vpop.f32.mrb[27].mxu0  ;;  %1209 = vmatpush3.bf16.msra.mxu1 %v669_v1 }
 0x328   :  { %v670_v9 = vpack.c.bf16 %v638_v8, %v635_v5 }
 0x32a   :  { %1210 = vmatprep.subr.bf16.mxu1 %v670_v9 }
 0x32b   :  { %1211 = vmatpush3.bf16.msra.mxu1 %v670_v9 }
 0x32c   :  { %v1200_v10 = vpop.f32.mrb[28].mxu0  ;;  %1212 = vmatprep.subr.bf16.mxu1 %v671_v7 }
 0x32d   :  { %v651_v11 = vpop.f32.mrb[29].mxu0 }
 0x32e   :  { %v1201_v12 = vpop.f32.mrb[30].mxu0 }
 0x32f   :  { %v673_v13 = vpack.c.bf16 %v1201_v12, %v1200_v10  ;;  %v654_v14 = vpop.f32.mrb[31].mxu0  ;;  %1213 = vmatpush3.bf16.msra.mxu1 %v671_v7 }
 0x330   :  { %v672_v15 = vpack.c.bf16 %v654_v14, %v651_v11 }
 0x332   :  { %1214 = vmatprep.subr.bf16.mxu1 %v672_v15 }
 0x333   :  { %1215 = vmatpush3.bf16.msra.mxu1 %v672_v15 }
 0x334   :  { %1216 = vmatprep.subr.bf16.mxu1 %v673_v13 }
 0x337   :  { %1217 = vmatpush3.bf16.msra.mxu1 %v673_v13 }
 0x33a   :  { %1219 = vmatmul.mubr.bf16.vlgmr.msra.gmra.mrb[16].mxu1 %v1578_v47 }
 0x33b   :  { %1222 = vmatprep.mubr.bf16.mxu1 %v1580_v48 }
 0x342   :  { %1223 = vmatmul.mubr.bf16.gmra.mrb[20].mxu1 %v1584_v49 }
 0x343   :  { %1226 = vmatprep.mubr.bf16.mxu1 %v1586_v50 }
 0x34a   :  { %1227 = vmatmul.mubr.bf16.gmra.mrb[24].mxu1 %v1590_v51 }
 0x34b   :  { %1230 = vmatprep.mubr.bf16.mxu1 %v1592_v52 }
 0x352   :  { %1231 = vmatmul.mubr.bf16.gmra.mrb[28].mxu1 %v1596_v53 }
 0x40d   :  { %v1220_v47 = vpop.f32.mrb[16].mxu1 }
 0x40e   :  { %v1616_v48 = vadd.f32 %v1220_v47, %v1041_v18  ;;  %v715_v49 = vpop.f32.mrb[17].mxu1 }
 0x40f   :  { %v1618_v50 = vadd.f32 %v1041_v18, %v715_v49  ;;  %v1221_v51 = vpop.f32.mrb[18].mxu1 }
 0x410   :  { %v1620_v19 = vadd.f32 %v1221_v51, %v1041_v18  ;;  %v718_v52 = vpop.f32.mrb[19].mxu1  ;;  %v783_v53 = vsel %vm780_vm0, %v1616_v48, -inf }
 0x411   :  { %v1625_v20 = vadd.f32 %v1041_v18, %v718_v52  ;;  %801 = vmax.xlane.f32.xlu1 %v783_v53  ;;  %v781_v21 = vsel %vm780_vm0, %v1618_v50, -inf }
 0x412   :  { %797 = vmax.xlane.f32.xlu0 %v781_v21  ;;  %v784_v22 = vsel %vm780_vm0, %v1620_v19, -inf }
 0x413   :  { %v782_v24 = vsel %vm780_vm0, %v1625_v20, -inf }
 0x415   :  { %803 = vmax.xlane.f32.xlu1 %v784_v22  ;;  %v1224_v23 = vpop.f32.mrb[20].mxu1 }
 0x416   :  { %v1636_v25 = vadd.f32 %v1224_v23, %v1041_v18  ;;  %v731_v26 = vpop.f32.mrb[21].mxu1  ;;  %799 = vmax.xlane.f32.xlu0 %v782_v24 }
 0x417   :  { %v1225_v27 = vpop.f32.mrb[22].mxu1  ;;  %v1643_v31 = vadd.f32 %v1041_v18, %v731_v26 }
 0x418   :  { %v1638_v28 = vadd.f32 %v1225_v27, %v1041_v18  ;;  %v734_v29 = vpop.f32.mrb[23].mxu1  ;;  %v787_v30 = vsel %vm780_vm0, %v1636_v25, -inf }
 0x419   :  { %v1645_v32 = vadd.f32 %v1041_v18, %v734_v29  ;;  %v785_v35 = vsel %vm780_vm0, %v1643_v31, -inf }
 0x41a   :  { %809 = vmax.xlane.f32.xlu0 %v787_v30  ;;  %v788_v33 = vsel %vm780_vm0, %v1638_v28, -inf }
 0x41b   :  { %811 = vmax.xlane.f32.xlu1 %v788_v33  ;;  %v786_v38 = vsel %vm780_vm0, %v1645_v32, -inf }
 0x41d   :  { %v1228_v34 = vpop.f32.mrb[24].mxu1 }
 0x41e   :  { %v1653_v36 = vadd.f32 %v1228_v34, %v1041_v18  ;;  %v747_v37 = vpop.f32.mrb[25].mxu1  ;;  %805 = vmax.xlane.f32.xlu0 %v785_v35 }
 0x41f   :  { %v1229_v39 = vpop.f32.mrb[26].mxu1  ;;  %807 = vmax.xlane.f32.xlu1 %v786_v38  ;;  %v1663_v43 = vadd.f32 %v1041_v18, %v747_v37 }
 0x420   :  { %v1658_v40 = vadd.f32 %v1229_v39, %v1041_v18  ;;  %v750_v41 = vpop.f32.mrb[27].mxu1  ;;  %v791_v42 = vsel %vm780_vm0, %v1653_v36, -inf }
 0x421   :  { %v1665_v44 = vadd.f32 %v1041_v18, %v750_v41  ;;  %v789_v54 = vsel %vm780_vm0, %v1663_v43, -inf }
 0x422   :  { %817 = vmax.xlane.f32.xlu0 %v791_v42  ;;  %v792_v45 = vsel %vm780_vm0, %v1658_v40, -inf }
 0x423   :  { %819 = vmax.xlane.f32.xlu1 %v792_v45  ;;  %v790_v57 = vsel %vm780_vm0, %v1665_v44, -inf }
 0x425   :  { %v1232_v46 = vpop.f32.mrb[28].mxu1 }
 0x426   :  { %v763_v55 = vpop.f32.mrb[29].mxu1  ;;  %813 = vmax.xlane.f32.xlu0 %v789_v54  ;;  %v1678_v61 = vadd.f32 %v1232_v46, %v1041_v18 }
 0x427   :  { %v1676_v58 = vadd.f32 %v1041_v18, %v763_v55  ;;  %v1233_v59 = vpop.f32.mrb[30].mxu1  ;;  %815 = vmax.xlane.f32.xlu1 %v790_v57 }
 0x428   :  { %v766_v60 = vpop.f32.mrb[31].mxu1  ;;  %v1685_v0 = vadd.f32 %v1233_v59, %v1041_v18  ;;  %v795_v1 = vsel %vm780_vm0, %v1678_v61, -inf }
 0x429   :  { %v1680_v62 = vadd.f32 %v1041_v18, %v766_v60  ;;  %v793_v63 = vsel %vm780_vm0, %v1676_v58, -inf }
 0x42a   :  { %821 = vmax.xlane.f32.xlu0 %v793_v63  ;;  %v796_v2 = vsel %vm780_vm0, %v1685_v0, -inf }
 0x42b   :  { %v794_v56 = vsel %vm780_vm0, %v1680_v62, -inf }
 0x42c   :  { %823 = vmax.xlane.f32.xlu1 %v794_v56 }
 0x42e   :  { %825 = vmax.xlane.f32.xlu0 %v795_v1 }
 0x430   :  { %827 = vmax.xlane.f32.xlu1 %v796_v2 }
 0x49e   :  { %v802_v3 = vpop.xlane.xlu1 %801 }
 0x49f   :  { %v1697_v4 = vsub.f32 %v1616_v48, %v802_v3  ;;  %v798_v5 = vpop.xlane.xlu0 %797 }
 0x4a0   :  { %v1700_v6 = vsub.f32 %v1618_v50, %v798_v5 }
 0x4a1   :  { %v849_v7 = vmul.f32 1.442695, %v1697_v4 }
 0x4a2   :  { %v845_v8 = vmul.f32 1.442695, %v1700_v6  ;;  %v804_v9 = vpop.xlane.xlu1 %803 }
 0x4a3   :  { %1275 = vpow2.f32 %v849_v7  ;;  %v1705_v10 = vsub.f32 %v1620_v19, %v804_v9  ;;  %v800_v11 = vpop.xlane.xlu0 %799 }
 0x4a4   :  { %v1708_v12 = vsub.f32 %v1625_v20, %v800_v11  ;;  %1277 = vpow2.f32 %v845_v8 }
 0x4a5   :  { %v851_v13 = vmul.f32 1.442695, %v1705_v10 }
 0x4a6   :  { %v847_v14 = vmul.f32 1.442695, %v1708_v12 }
 0x4a7   :  { %1279 = vpow2.f32 %v851_v13  ;;  %v810_v15 = vpop.xlane.xlu0 %809 }
 0x4a8   :  { %v1713_v16 = vsub.f32 %v1636_v25, %v810_v15  ;;  %v812_v18 = vpop.xlane.xlu1 %811  ;;  %1281 = vpow2.f32 %v847_v14 }
 0x4a9   :  { %v1716_v47 = vsub.f32 %v1638_v28, %v812_v18 }
 0x4aa   :  { %v857_v48 = vmul.f32 1.442695, %v1713_v16 }
 0x4ab   :  { %v859_v49 = vmul.f32 1.442695, %v1716_v47  ;;  %v806_v50 = vpop.xlane.xlu0 %805 }
 0x4ac   :  { %1283 = vpow2.f32 %v857_v48  ;;  %v1721_v51 = vsub.f32 %v1643_v31, %v806_v50  ;;  %v808_v19 = vpop.xlane.xlu1 %807 }
 0x4ad   :  { %v1276_v52 = vpop.eup %1275  ;;  %1285 = vpow2.f32 %v859_v49  ;;  %v1724_v53 = vsub.f32 %v1645_v32, %v808_v19 }
 0x4ae   :  { %v853_v20 = vmul.f32 1.442695, %v1721_v51  ;;  %v879_v21 = vsel %vm780_vm0, %v1276_v52, 0.0  ;;  %v1278_v22 = vpop.eup %1277 }
 0x4af   :  { %v855_v23 = vmul.f32 1.442695, %v1724_v53  ;;  %897 = vadd.xlane.f32.xlu0 %v879_v21  ;;  %v818_v24 = vpop.xlane.xlu0 %817  ;;  %v877_v31 = vsel %vm780_vm0, %v1278_v22, 0.0 }
 0x4b0   :  { %1287 = vpow2.f32 %v853_v20  ;;  %v1731_v25 = vsub.f32 %v1653_v36, %v818_v24  ;;  %v820_v26 = vpop.xlane.xlu1 %819 }
 0x4b1   :  { %v1280_v27 = vpop.eup %1279  ;;  %1289 = vpow2.f32 %v855_v23  ;;  %v1734_v28 = vsub.f32 %v1658_v40, %v820_v26 }
 0x4b2   :  { %v865_v29 = vmul.f32 1.442695, %v1731_v25  ;;  %v880_v30 = vsel %vm780_vm0, %v1280_v27, 0.0  ;;  %v1282_v32 = vpop.eup %1281 }
 0x4b3   :  { %v867_v33 = vmul.f32 1.442695, %v1734_v28  ;;  %899 = vadd.xlane.f32.xlu1 %v880_v30  ;;  %893 = vadd.xlane.f32.xlu0 %v877_v31  ;;  %v814_v34 = vpop.xlane.xlu0 %813  ;;  %v878_v40 = vsel %vm780_vm0, %v1282_v32, 0.0 }
 0x4b4   :  { %1291 = vpow2.f32 %v865_v29  ;;  %v1743_v35 = vsub.f32 %v1663_v43, %v814_v34  ;;  %v816_v36 = vpop.xlane.xlu1 %815 }
 0x4b5   :  { %1293 = vpow2.f32 %v867_v33  ;;  %v1746_v37 = vsub.f32 %v1665_v44, %v816_v36 }
 0x4b6   :  { %v1284_v38 = vpop.eup %1283  ;;  %v861_v39 = vmul.f32 1.442695, %v1743_v35 }
 0x4b7   :  { %v1286_v41 = vpop.eup %1285  ;;  %v863_v42 = vmul.f32 1.442695, %v1746_v37  ;;  %895 = vadd.xlane.f32.xlu1 %v878_v40  ;;  %v822_v45 = vpop.xlane.xlu0 %821  ;;  %v883_v43 = vsel %vm780_vm0, %v1284_v38, 0.0 }
 0x4b8   :  { %1295 = vpow2.f32 %v861_v39  ;;  %v1755_v46 = vsub.f32 %v1676_v58, %v822_v45  ;;  %905 = vadd.xlane.f32.xlu0 %v883_v43  ;;  %v884_v59 = vsel %vm780_vm0, %v1286_v41, 0.0 }
 0x4b9   :  { %1297 = vpow2.f32 %v863_v42  ;;  %v824_v44 = vpop.xlane.xlu1 %823 }
 0x4ba   :  { %v1288_v54 = vpop.eup %1287  ;;  %v869_v55 = vmul.f32 1.442695, %v1755_v46  ;;  %v1759_v57 = vsub.f32 %v1680_v62, %v824_v44 }
 0x4bb   :  { %v1290_v60 = vpop.eup %1289  ;;  %907 = vadd.xlane.f32.xlu1 %v884_v59  ;;  %v826_v63 = vpop.xlane.xlu0 %825  ;;  %v881_v56 = vsel %vm780_vm0, %v1288_v54, 0.0 }
 0x4bc   :  { %1299 = vpow2.f32 %v869_v55  ;;  %v871_v58 = vmul.f32 1.442695, %v1759_v57  ;;  %v1767_v1 = vsub.f32 %v1678_v61, %v826_v63  ;;  %901 = vadd.xlane.f32.xlu0 %v881_v56  ;;  %v882_v7 = vsel %vm780_vm0, %v1290_v60, 0.0 }
 0x4bd   :  { %v828_v2 = vpop.xlane.xlu1 %827 }
 0x4be   :  { %v1292_v3 = vpop.eup %1291  ;;  %1301 = vpow2.f32 %v871_v58  ;;  %v873_v62 = vmul.f32 1.442695, %v1767_v1  ;;  %v1771_v5 = vsub.f32 %v1685_v0, %v828_v2 }
 0x4bf   :  { %v1294_v8 = vpop.eup %1293  ;;  %903 = vadd.xlane.f32.xlu1 %v882_v7  ;;  %v887_v9 = vsel %vm780_vm0, %v1292_v3, 0.0 }
 0x4c0   :  { %1303 = vpow2.f32 %v873_v62  ;;  %v875_v61 = vmul.f32 1.442695, %v1771_v5  ;;  %913 = vadd.xlane.f32.xlu0 %v887_v9  ;;  %v888_v13 = vsel %vm780_vm0, %v1294_v8, 0.0 }
 0x4c2   :  { %v1296_v11 = vpop.eup %1295  ;;  %1305 = vpow2.f32 %v875_v61 }
 0x4c3   :  { %v1298_v14 = vpop.eup %1297  ;;  %915 = vadd.xlane.f32.xlu1 %v888_v13  ;;  %v885_v0 = vsel %vm780_vm0, %v1296_v11, 0.0 }
 0x4c4   :  { %909 = vadd.xlane.f32.xlu0 %v885_v0  ;;  %v886_v18 = vsel %vm780_vm0, %v1298_v14, 0.0 }
 0x4c6   :  { %v1300_v15 = vpop.eup %1299 }
 0x4c7   :  { %911 = vadd.xlane.f32.xlu1 %v886_v18  ;;  %v889_v48 = vsel %vm780_vm0, %v1300_v15, 0.0 }
 0x4c8   :  { %v1302_v49 = vpop.eup %1301  ;;  %917 = vadd.xlane.f32.xlu0 %v889_v48 }
 0x4c9   :  { %v890_v50 = vsel %vm780_vm0, %v1302_v49, 0.0 }
 0x4ca   :  { %v1304_v19 = vpop.eup %1303 }
 0x4cb   :  { %919 = vadd.xlane.f32.xlu1 %v890_v50  ;;  %v891_v52 = vsel %vm780_vm0, %v1304_v19, 0.0 }
 0x4cc   :  { %v1306_v20 = vpop.eup %1305  ;;  %921 = vadd.xlane.f32.xlu0 %v891_v52 }
 0x4cd   :  { %v892_v21 = vsel %vm780_vm0, %v1306_v20, 0.0 }
 0x4cf   :  { %923 = vadd.xlane.f32.xlu1 %v892_v21 }
 0x53c   :  { %v898_v22 = vpop.xlane.xlu0 %897 }
 0x53d   :  { %1307 = vlog2.f32 %v898_v22 }
 0x540   :  { %v900_v23 = vpop.xlane.xlu1 %899  ;;  %v894_v24 = vpop.xlane.xlu0 %893 }
 0x541   :  { %1309 = vlog2.f32 %v900_v23 }
 0x542   :  { %1311 = vlog2.f32 %v894_v24 }
 0x544   :  { %v896_v26 = vpop.xlane.xlu1 %895 }
 0x545   :  { %1313 = vlog2.f32 %v896_v26  ;;  %v906_v27 = vpop.xlane.xlu0 %905 }
 0x546   :  { %1315 = vlog2.f32 %v906_v27 }
 0x547   :  { %v1308_v29 = vpop.eup %1307 }
 0x548   :  { %v930_v30 = vmul.f32 0.6931472, %v1308_v29  ;;  %v908_v31 = vpop.xlane.xlu1 %907 }
 0x549   :  { %1317 = vlog2.f32 %v908_v31  ;;  %v902_v32 = vpop.xlane.xlu0 %901 }
 0x54a   :  { %v959_v33 = vsub.f32 %v1697_v4, %v930_v30  ;;  %1319 = vlog2.f32 %v902_v32 }
 0x54b   :  { %v1310_v17 = vpop.eup %1309 }
 0x54c   :  { %v1312_v34 = vpop.eup %1311  ;;  %975 = vst [vmem:[#allocation10 + $0x10] sm:$0xff] %v959_v33  ;;  %v932_v36 = vmul.f32 0.6931472, %v1310_v17  ;;  %v904_v38 = vpop.xlane.xlu1 %903 }
 0x54d   :  { %v926_v39 = vmul.f32 0.6931472, %v1312_v34  ;;  %1321 = vlog2.f32 %v904_v38  ;;  %v914_v40 = vpop.xlane.xlu0 %913 }
 0x54e   :  { %v960_v41 = vsub.f32 %v1705_v10, %v932_v36  ;;  %1323 = vlog2.f32 %v914_v40 }
 0x54f   :  { %v1314_v42 = vpop.eup %1313  ;;  %v957_v45 = vsub.f32 %v1700_v6, %v926_v39 }
 0x550   :  { %v1316_v43 = vpop.eup %1315  ;;  %976 = vst [vmem:[#allocation10 + $0x18] sm:$0xff] %v960_v41  ;;  %v928_v44 = vmul.f32 0.6931472, %v1314_v42  ;;  %v916_v54 = vpop.xlane.xlu1 %915 }
 0x551   :  { %973 = vst [vmem:[#allocation10] sm:$0xff] %v957_v45  ;;  %v938_v4 = vmul.f32 0.6931472, %v1316_v43  ;;  %1325 = vlog2.f32 %v916_v54  ;;  %v910_v55 = vpop.xlane.xlu0 %909 }
 0x552   :  { %v958_v59 = vsub.f32 %v1708_v12, %v928_v44  ;;  %1327 = vlog2.f32 %v910_v55 }
 0x553   :  { %v1318_v60 = vpop.eup %1317  ;;  %v963_v63 = vsub.f32 %v1713_v16, %v938_v4 }
 0x554   :  { %v1320_v56 = vpop.eup %1319  ;;  %974 = vst [vmem:[#allocation10 + $0x8] sm:$0xff] %v958_v59  ;;  %v940_v10 = vmul.f32 0.6931472, %v1318_v60  ;;  %v912_v58 = vpop.xlane.xlu1 %911 }
 0x555   :  { %979 = vst [vmem:[#allocation10 + $0x30] sm:$0xff] %v963_v63  ;;  %v934_v6 = vmul.f32 0.6931472, %v1320_v56  ;;  %1329 = vlog2.f32 %v912_v58  ;;  %v918_v2 = vpop.xlane.xlu0 %917 }
 0x556   :  { %v964_v3 = vsub.f32 %v1716_v47, %v940_v10  ;;  %1331 = vlog2.f32 %v918_v2 }
 0x557   :  { %v1322_v62 = vpop.eup %1321  ;;  %v961_v7 = vsub.f32 %v1721_v51, %v934_v6 }
 0x558   :  { %v1324_v8 = vpop.eup %1323  ;;  %980 = vst [vmem:[#allocation10 + $0x38] sm:$0xff] %v964_v3  ;;  %v936_v12 = vmul.f32 0.6931472, %v1322_v62  ;;  %v920_v9 = vpop.xlane.xlu1 %919 }
 0x559   :  { %977 = vst [vmem:[#allocation10 + $0x20] sm:$0xff] %v961_v7  ;;  %v946_v16 = vmul.f32 0.6931472, %v1324_v8  ;;  %1333 = vlog2.f32 %v920_v9  ;;  %v922_v61 = vpop.xlane.xlu0 %921 }
 0x55a   :  { %v962_v11 = vsub.f32 %v1724_v53, %v936_v12  ;;  %1335 = vlog2.f32 %v922_v61 }
 0x55b   :  { %v1326_v13 = vpop.eup %1325  ;;  %v967_v14 = vsub.f32 %v1731_v25, %v946_v16 }
 0x55c   :  { %v1328_v0 = vpop.eup %1327  ;;  %978 = vst [vmem:[#allocation10 + $0x28] sm:$0xff] %v962_v11  ;;  %v948_v47 = vmul.f32 0.6931472, %v1326_v13  ;;  %v924_v15 = vpop.xlane.xlu1 %923 }
 0x55d   :  { %983 = vst [vmem:[#allocation10 + $0x50] sm:$0xff] %v967_v14  ;;  %v942_v51 = vmul.f32 0.6931472, %v1328_v0  ;;  %1337 = vlog2.f32 %v924_v15 }
 0x55e   :  { %v968_v18 = vsub.f32 %v1734_v28, %v948_v47 }
 0x55f   :  { %v1330_v48 = vpop.eup %1329  ;;  %v965_v49 = vsub.f32 %v1743_v35, %v942_v51 }
 0x560   :  { %v1332_v50 = vpop.eup %1331  ;;  %984 = vst [vmem:[#allocation10 + $0x58] sm:$0xff] %v968_v18  ;;  %v944_v19 = vmul.f32 0.6931472, %v1330_v48 }
 0x561   :  { %981 = vst [vmem:[#allocation10 + $0x40] sm:$0xff] %v965_v49  ;;  %v950_v53 = vmul.f32 0.6931472, %v1332_v50 }
 0x562   :  { %v966_v52 = vsub.f32 %v1746_v37, %v944_v19 }
 0x563   :  { %v1334_v25 = vpop.eup %1333  ;;  %v969_v20 = vsub.f32 %v1755_v46, %v950_v53 }
 0x564   :  { %v1336_v21 = vpop.eup %1335  ;;  %982 = vst [vmem:[#allocation10 + $0x48] sm:$0xff] %v966_v52  ;;  %v952_v22 = vmul.f32 0.6931472, %v1334_v25 }
 0x565   :  { %985 = vst [vmem:[#allocation10 + $0x60] sm:$0xff] %v969_v20  ;;  %v954_v23 = vmul.f32 0.6931472, %v1336_v21 }
 0x566   :  { %v970_v28 = vsub.f32 %v1759_v57, %v952_v22 }
 0x567   :  { %v1338_v24 = vpop.eup %1337  ;;  %v971_v35 = vsub.f32 %v1767_v1, %v954_v23 }
 0x568   :  { %986 = vst [vmem:[#allocation10 + $0x68] sm:$0xff] %v970_v28  ;;  %v956_v26 = vmul.f32 0.6931472, %v1338_v24 }
 0x569   :  { %987 = vst [vmem:[#allocation10 + $0x70] sm:$0xff] %v971_v35 }
 0x56a   :  { %v972_v37 = vsub.f32 %v1771_v5, %v956_v26 }
 0x56c   :  { %988 = vst [vmem:[#allocation10 + $0x78] sm:$0xff] %v972_v37 }
 0x56d   :  { %1438 = shalt.err (!%p1435_p8)
}
 0x56e   :  { %s1439_s26 = scalar_lea.hbm %s1826_s6, 2048 }
 0x56f   :  { %p1440_p9 = scmp.ne.s32.totalorder %s1826_s6, %s1439_s26  ;;  %p1443_p10 = scmp.lt.u32.totalorder %s1439_s26, %s1826_s6 }
 0x571   :  { %p1445_p11 = pnand %p1443_p10, %p1440_p9 }
 0x573   :  { %1448 = shalt.err (!%p1445_p11)
}
 0x574   :  { %s1464_s7 = smov 128   ;;  %s1465_s8 = smov 8  }
 0x575   :  { %1000 = dma.vmem_to_hbm [thread:$0]  %s995_s21, 2048, %s1826_s6, [#allocation4], %s1464_s7, %s1464_s7, %s1465_s8  }
 0x576   :  { %1455 = dma.done.wait [#allocation4], 2048  }
 0x577   :  { %1456 = vsyncadd [#allocation4], 4294965248 }
 0x578   :  { %1004 = vsyncpa [#allocation3], 1 }
 0x579   :  { %1005 = vsyncpa [#allocation6], 1 }
 0x57a   :  { %1006 = vsyncpa [#allocation9], 1 }
 0x57b   :  { %1007 = vsyncpa [#allocation4], 1 }

</bundles_post_ra>
